<compile_context>
chip_gen: v7x
topology: tpu7x:2x2x1
jax: 0.10.0
libtpu: 0.0.40
codegen_flags: <defaults>
</compile_context>

<pallas_src>
import functools
import math

import numpy as np
import jax
import jax.numpy as jnp
from jax.experimental import pallas as pl
from jax.experimental.pallas import tpu as pltpu


# ---------------------------------------------------------------------------
# helpers
# ---------------------------------------------------------------------------

def _ceil_to(x, m):
    return ((int(x) + m - 1) // m) * m


def _const_spec(shape):
    zeros = (0,) * len(shape)
    return pl.BlockSpec(shape, lambda *_: zeros)


def _vmem_limit(raw_bytes):
    # generous: 3x the raw buffer estimate (covers double-buffering + compiler
    # internal scratch), clamped to a sane range.
    return int(min(max(3 * int(raw_bytes), 8 * 1024 * 1024), 100 * 1024 * 1024))


# ---------------------------------------------------------------------------
# Kernel 1: M-tiled node encode — ONE fused matmul  y = feat @ [W_iou | W_f] + b
# ---------------------------------------------------------------------------

def _encode_kernel(out3, feat_ref, w_ref, b_ref, wiou_ref, wf_ref):
    y = (jnp.dot(feat_ref[...], w_ref[...], preferred_element_type=jnp.float32)
         + b_ref[...])
    wiou_ref[...] = y[:, :out3]          # gate-blocked (3*out_pad), 128-lane aligned
    wf_ref[...] = y[:, out3:]            # W_f activation (out_pad)


def encode_all_nodes(feat_slot, enc_w, enc_b, out_pad, *, tm):
    m_pad, in_pad = feat_slot.shape
    ncols = enc_w.shape[1]               # 4 * out_pad
    out3 = 3 * out_pad
    raw_bytes = 4 * (tm * in_pad + in_pad * ncols + ncols + tm * ncols)
    return pl.pallas_call(
        functools.partial(_encode_kernel, out3),
        grid=(m_pad // tm,),
        in_specs=[
            pl.BlockSpec((tm, in_pad), lambda i: (i, 0)),       # node-tile stream
            pl.BlockSpec((in_pad, ncols), lambda i: (0, 0)),    # fused weights
            pl.BlockSpec((1, ncols), lambda i: (0, 0)),         # fused bias
        ],
        out_specs=(
            pl.BlockSpec((tm, out3), lambda i: (i, 0)),
            pl.BlockSpec((tm, out_pad), lambda i: (i, 0)),
        ),
        out_shape=(jax.ShapeDtypeStruct((m_pad, out3), jnp.float32),
                   jax.ShapeDtypeStruct((m_pad, out_pad), jnp.float32)),
        compiler_params=pltpu.CompilerParams(
            dimension_semantics=("parallel",),
            vmem_limit_bytes=_vmem_limit(raw_bytes)),
    )(feat_slot, enc_w, enc_b)


# ---------------------------------------------------------------------------
# Kernel 2: fused tree-level recurrence.
#   grid=(num_levels,); per-level operands (W_iou/W_f slots, one-hot G/S/P) streamed
#   via BlockSpec; h/c state resident in the constant-index output blocks; all
#   gather/scatter/segment-sum work is MXU matmuls with host-built one-hot operators.
# ---------------------------------------------------------------------------

def _tree_levels_kernel(out_pad, n_cap,
                        # scalar prefetch (flat 1-D SMEM table)
                        edge_cnt_ref,
                        # per-level streamed inputs
                        wiou_ref, wf_ref, g_ref, s_ref, p_ref,
                        # level-invariant weights / selectors
                        uiou_ref, uf_ref, fcw_ref, fcb_ref,
                        rsel_ref, rfeat_ref, s1w_ref, s1b_ref, s2w_ref, s2b_ref,
                        # outputs (h/c double as the VMEM-resident recurrent state)
                        h_ref, c_ref, veri_ref, summ_ref,
                        # scratch
                        hsum, csum):
    lvl = pl.program_id(0)
    last = pl.num_programs(0) - 1

    @pl.when(lvl == 0)
    def _init():
        h_ref[...] = jnp.zeros_like(h_ref)
        c_ref[...] = jnp.zeros_like(c_ref)

    hsum[...] = jnp.zeros_like(hsum)
    csum[...] = jnp.zeros_like(csum)

    # ---- edge block: child gathers, forget gates, segment sums (all matmuls) ----
    @pl.when(edge_cnt_ref[lvl] > 0)
    def _edges():
        gmat = g_ref[...]                                             # (e_cap, S)
        child_h = jnp.dot(gmat, h_ref[...], preferred_element_type=jnp.float32)
        child_c = jnp.dot(gmat, c_ref[...], preferred_element_type=jnp.float32)
        wf_par = jnp.dot(p_ref[...], wf_ref[...],
                         preferred_element_type=jnp.float32)          # W_f[parent]
        f = jax.nn.sigmoid(
            wf_par + jnp.dot(child_h, uf_ref[...],
                             preferred_element_type=jnp.float32))
        fcv = f * child_c
        smat = s_ref[...]                                             # (n_cap, e_cap)
        hsum[...] = jnp.dot(smat, child_h, preferred_element_type=jnp.float32)
        csum[...] = jnp.dot(smat, fcv, preferred_element_type=jnp.float32)

    # ---- node block: iou gates (gate blocks are 128-lane aligned) ----
    iou = wiou_ref[...] + jnp.dot(hsum[...], uiou_ref[...],
                                  preferred_element_type=jnp.float32)
    i_g = jax.nn.sigmoid(iou[:, :out_pad])
    o_g = jax.nn.sigmoid(iou[:, out_pad:2 * out_pad])
    u_g = jnp.tanh(iou[:, 2 * out_pad:3 * out_pad])
    c_new = i_g * u_g + csum[...]
    h_new = o_g * jnp.tanh(c_new)

    # contiguous, 8-aligned scatter into the level-slot state layout
    row = pl.multiple_of(lvl * n_cap, 8)
    c_ref[pl.ds(row, n_cap), :] = c_new
    h_ref[pl.ds(row, n_cap), :] = h_new

    # ---- epilogue: root-only verification + summarisation heads ----
    @pl.when(lvl == last)
    def _heads():
        root_h = jnp.dot(rsel_ref[...], h_ref[...],
                         preferred_element_type=jnp.float32)
        # USE_DROPOUT: eval mode -> classifier_dropout is identity
        veri_ref[...] = (jnp.dot(root_h, fcw_ref[...],
                                 preferred_element_type=jnp.float32) + fcb_ref[...])
        s1 = (jnp.dot(rfeat_ref[...], s1w_ref[...],
                      preferred_element_type=jnp.float32) + s1b_ref[...])
        summ_ref[...] = (jnp.dot(s1, s2w_ref[...],
                                 preferred_element_type=jnp.float32) + s2b_ref[...])


# ---------------------------------------------------------------------------
# Parameter init (torch.nn.Linear-style), pre-transposed + 128-lane padded
# ---------------------------------------------------------------------------

def init_params(key, in_features, out_features):
    in_pad = _ceil_to(in_features, 128)
    out_pad = _ceil_to(out_features, 128)
    head_pad = 128

    def linear_np(k, fan_in, fan_out, bias=True):
        bound = 1.0 / math.sqrt(fan_in)
        kw, kb = jax.random.split(k)
        w = np.asarray(jax.random.uniform(kw, (fan_out, fan_in), jnp.float32,
                                          -bound, bound))
        b = (np.asarray(jax.random.uniform(kb, (fan_out,), jnp.float32,
                                           -bound, bound))
             if bias else np.zeros((fan_out,), np.float32))
        return w, b

    keys = jax.random.split(key, 7)
    W_iou, b_iou = linear_np(keys[0], in_features, 3 * out_features)
    U_iou, _ = linear_np(keys[1], out_features, 3 * out_features, bias=False)
    W_f, b_f = linear_np(keys[2], in_features, out_features)
    U_f, _ = linear_np(keys[3], out_features, out_features, bias=False)
    Wfc, bfc = linear_np(keys[4], out_features, 2)
    Ws1, bs1 = linear_np(keys[5], in_features, out_features)
    Ws2, bs2 = linear_np(keys[6], out_features, 2)

    def pad_plain(w, rows, cols):          # torch (fan_out, fan_in) -> transposed/padded
        out = np.zeros((rows, cols), np.float32)
        out[:w.shape[1], :w.shape[0]] = w.T
        return out

    def pad_bias(b, cols):
        out = np.zeros((1, cols), np.float32)
        out[0, :b.shape[0]] = b
        return out

    def pad_gates(w, rows):                # (3*out, fan_in) -> (rows, 3*out_pad) gate-blocked
        out = np.zeros((rows, 3 * out_pad), np.float32)
        for g in range(3):
            blk = w[g * out_features:(g + 1) * out_features, :].T
            out[:blk.shape[0], g * out_pad:g * out_pad + out_features] = blk
        return out

    def pad_gates_bias(b):
        out = np.zeros((1, 3 * out_pad), np.float32)
        for g in range(3):
            out[0, g * out_pad:g * out_pad + out_features] = \
                b[g * out_features:(g + 1) * out_features]
        return out

    # fused encode weight: [gate-blocked W_iou | W_f] along N -> one MXU weight pass
    enc_w = np.zeros((in_pad, 4 * out_pad), np.float32)
    enc_w[:, :3 * out_pad] = pad_gates(W_iou, in_pad)
    enc_w[:in_features, 3 * out_pad:3 * out_pad + out_features] = W_f.T
    enc_b = np.zeros((1, 4 * out_pad), np.float32)
    enc_b[:, :3 * out_pad] = pad_gates_bias(b_iou)
    enc_b[0, 3 * out_pad:3 * out_pad + out_features] = b_f

    params = {
        'enc_w': jnp.asarray(enc_w),
        'enc_b': jnp.asarray(enc_b),
        'uiou_wt': jnp.asarray(pad_gates(U_iou, out_pad)),
        'uf_wt': jnp.asarray(pad_plain(U_f, out_pad, out_pad)),
        'fc_wt': jnp.asarray(pad_plain(Wfc, out_pad, head_pad)),
        'fc_b': jnp.asarray(pad_bias(bfc, head_pad)),
        's1_wt': jnp.asarray(pad_plain(Ws1, in_pad, out_pad)),
        's1_b': jnp.asarray(pad_bias(bs1, out_pad)),
        's2_wt': jnp.asarray(pad_plain(Ws2, out_pad, head_pad)),
        's2_b': jnp.asarray(pad_bias(bs2, head_pad)),
    }
    raw = {'W_iou': W_iou, 'b_iou': b_iou, 'U_iou': U_iou, 'W_f': W_f, 'b_f': b_f,
           'U_f': U_f, 'fc_w': Wfc, 'fc_b': bfc, 's1_w': Ws1, 's1_b': bs1,
           's2_w': Ws2, 's2_b': bs2}
    return params, raw


# ---------------------------------------------------------------------------
# TreeLSTM forward (mirrors TreeLSTM.forward / _run_lstm, minus the BERT encoder)
# ---------------------------------------------------------------------------

def tree_lstm_forward(params, features, node_order, adjacency_list, edge_order,
                      root_node, in_features, out_features):
    node_order_np = np.asarray(node_order)
    edge_order_np = np.asarray(edge_order)
    adj_np = np.asarray(adjacency_list).reshape(-1, 2)
    root_np = np.asarray(root_node).reshape(-1)
    feats_np = np.asarray(features, np.float32)

    num_nodes = int(node_order_np.shape[0])
    num_roots = int(root_np.shape[0])
    num_levels = int(node_order_np.max()) + 1

    in_pad = _ceil_to(in_features, 128)
    out_pad = _ceil_to(out_features, 128)
    head_pad = 128

    # ---- host-side tree bookkeeping: level-sorted "level-slot" layout ----
    node_lists = [np.nonzero(node_order_np == l)[0] for l in range(num_levels)]
    edge_lists = [np.nonzero(edge_order_np == l)[0] for l in range(num_levels)]

    n_cap = max(8, _ceil_to(max(len(x) for x in node_lists), 8))
    e_cap = max(8, _ceil_to(max(max((len(x) for x in edge_lists), default=0), 1), 8))
    r_cap = max(8, _ceil_to(num_roots, 8))
    state_rows = num_levels * n_cap            # level l, slot s -> row l*n_cap + s

    slot_of = np.zeros((num_nodes,), np.int64)
    for l, nl in enumerate(node_lists):
        slot_of[nl] = l * n_cap + np.arange(len(nl))

    # level-slotted feature matrix (M-tiled encode input)
    tm = 256 if state_rows > 256 else state_rows
    m_pad = _ceil_to(state_rows, tm)
    feat_slot = np.zeros((m_pad, in_pad), np.float32)
    feat_slot[slot_of, :in_features] = feats_np

    # per-level one-hot operators: child gather G, parent gather P, segment-sum S
    G = np.zeros((num_levels, e_cap, state_rows), np.float32)
    S = np.zeros((num_levels, n_cap, e_cap), np.float32)
    P = np.zeros((num_levels, e_cap, n_cap), np.float32)
    edge_cnt = np.zeros((num_levels,), np.int32)
    for l in range(1, num_levels):
        el = edge_lists[l]
        if len(el) == 0:
            continue
        a = adj_np[el]
        par, ch = a[:, 0], a[:, 1]
        seg = np.searchsorted(node_lists[l], par)       # parent slot within level l
        ei = np.arange(len(el))
        G[l, ei, slot_of[ch]] = 1.0
        S[l, seg, ei] = 1.0
        P[l, ei, seg] = 1.0
        edge_cnt[l] = len(el)

    # root selector + root features (summ head runs only on root rows)
    R = np.zeros((r_cap, state_rows), np.float32)
    R[np.arange(num_roots), slot_of[root_np]] = 1.0
    root_feat = np.zeros((r_cap, in_pad), np.float32)
    root_feat[:num_roots, :in_features] = feats_np[root_np]

    # ---- 1) M-tiled fused encode pass ----
    wiou_all, wf_all = encode_all_nodes(jnp.asarray(feat_slot), params['enc_w'],
                                        params['enc_b'], out_pad, tm=tm)

    # ---- 2) fused per-level recurrence ----
    kernel = functools.partial(_tree_levels_kernel, out_pad, n_cap)
    consts = (params['uiou_wt'], params['uf_wt'], params['fc_wt'], params['fc_b'],
              jnp.asarray(R), jnp.asarray(root_feat),
              params['s1_wt'], params['s1_b'], params['s2_wt'], params['s2_b'])

    raw_bytes = 4 * (
        2 * (n_cap * 3 * out_pad + n_cap * out_pad + e_cap * state_rows
             + n_cap * e_cap + e_cap * n_cap)                    # streamed (dbl buf)
        + 2 * sum(int(np.prod(c.shape)) for c in consts)         # constants
        + 2 * (2 * state_rows * out_pad + 2 * r_cap * head_pad)  # outputs
        + 2 * n_cap * out_pad)                                   # scratch

    grid_spec = pltpu.PrefetchScalarGridSpec(
        num_scalar_prefetch=1,
        grid=(num_levels,),
        in_specs=[
            pl.BlockSpec((n_cap, 3 * out_pad), lambda l, ec: (l, 0)),      # W_iou(x)
            pl.BlockSpec((n_cap, out_pad), lambda l, ec: (l, 0)),          # W_f(x)
            pl.BlockSpec((None, e_cap, state_rows), lambda l, ec: (l, 0, 0)),  # G
            pl.BlockSpec((None, n_cap, e_cap), lambda l, ec: (l, 0, 0)),       # S
            pl.BlockSpec((None, e_cap, n_cap), lambda l, ec: (l, 0, 0)),       # P
        ] + [_const_spec(c.shape) for c in consts],
        out_specs=(
            _const_spec((state_rows, out_pad)),          # h (VMEM-resident state)
            _const_spec((state_rows, out_pad)),          # c (VMEM-resident state)
            _const_spec((r_cap, head_pad)),              # veri logits
            _const_spec((r_cap, head_pad)),              # summ logits
        ),
        scratch_shapes=[pltpu.VMEM((n_cap, out_pad), jnp.float32),   # h_sum
                        pltpu.VMEM((n_cap, out_pad), jnp.float32)],  # c_sum
    )

    h_slot, c_slot, veri_pad, summ_pad = pl.pallas_call(
        kernel,
        out_shape=(jax.ShapeDtypeStruct((state_rows, out_pad), jnp.float32),
                   jax.ShapeDtypeStruct((state_rows, out_pad), jnp.float32),
                   jax.ShapeDtypeStruct((r_cap, head_pad), jnp.float32),
                   jax.ShapeDtypeStruct((r_cap, head_pad), jnp.float32)),
        grid_spec=grid_spec,
        compiler_params=pltpu.CompilerParams(
            dimension_semantics=("arbitrary",),
            vmem_limit_bytes=_vmem_limit(raw_bytes)),
    )(jnp.asarray(edge_cnt), wiou_all, wf_all,
      jnp.asarray(G), jnp.asarray(S), jnp.asarray(P), *consts)

    # un-permute from level-slot layout back to original node order
    slot_idx = jnp.asarray(slot_of.astype(np.int32))
    h = h_slot[slot_idx, :out_features]
    c = c_slot[slot_idx, :out_features]
    veri_logits = veri_pad[:num_roots, :2]
    summ_logits = summ_pad[:num_roots, :2]
    return h, veri_logits, c, summ_logits


# ---------------------------------------------------------------------------
# Pure-numpy reference (unpadded math) for correctness checking
# ---------------------------------------------------------------------------

def _sigmoid_np(x):
    return 1.0 / (1.0 + np.exp(-x))


def reference_forward(raw, feats, node_order, adj, edge_order, root, out_features):
    feats = np.asarray(feats, np.float32)
    n_nodes = feats.shape[0]
    h = np.zeros((n_nodes, out_features), np.float32)
    c = np.zeros((n_nodes, out_features), np.float32)

    def lin(x, W, b=None):
        y = x @ W.T
        return y + b if b is not None else y

    summ = lin(lin(feats[root], raw['s1_w'], raw['s1_b']), raw['s2_w'], raw['s2_b'])
    for it in range(int(node_order.max()) + 1):
        nidx = np.nonzero(node_order == it)[0]
        x = feats[nidx]
        if it == 0:
            iou = lin(x, raw['W_iou'], raw['b_iou'])
            csum = np.zeros((len(nidx), out_features), np.float32)
        else:
            eidx = np.nonzero(edge_order == it)[0]
            a = adj[eidx]
            par, ch = a[:, 0], a[:, 1]
            child_h, child_c = h[ch], c[ch]
            seg = np.searchsorted(nidx, par)
            hsum = np.zeros((len(nidx), out_features), np.float32)
            np.add.at(hsum, seg, child_h)
            iou = lin(x, raw['W_iou'], raw['b_iou']) + lin(hsum, raw['U_iou'])
            f = _sigmoid_np(lin(feats[par], raw['W_f'], raw['b_f'])
                            + lin(child_h, raw['U_f']))
            fcv = f * child_c
            csum = np.zeros_like(hsum)
            np.add.at(csum, seg, fcv)
        of = out_features
        i = _sigmoid_np(iou[:, :of])
        o = _sigmoid_np(iou[:, of:2 * of])
        u = np.tanh(iou[:, 2 * of:3 * of])
        cn = i * u + csum
        hn = o * np.tanh(cn)
        c[nidx] = cn
        h[nidx] = hn
    veri = lin(h[root], raw['fc_w'], raw['fc_b'])
    return h, veri, c, summ


# ---------------------------------------------------------------------------
# Demo
# ---------------------------------------------------------------------------

if __name__ == "__main__":
    in_features = 32
    out_features = 16

    key = jax.random.PRNGKey(0)
    k_feat, k_param = jax.random.split(key)

    # synthetic tree with 8 nodes:
    #   0 (root) -> {1, 2};  1 -> {3, 4};  2 -> {5, 6, 7}
    num_nodes = 8
    features = jax.random.normal(k_feat, (num_nodes, in_features), jnp.float32)
    node_order = np.array([2, 1, 1, 0, 0, 0, 0, 0], dtype=np.int32)
    adjacency_list = np.array([[0, 1], [0, 2],
                               [1, 3], [1, 4],
                               [2, 5], [2, 6], [2, 7]], dtype=np.int32)
    edge_order = np.array([2, 2, 1, 1, 1, 1, 1], dtype=np.int32)
    root_node = np.array([0], dtype=np.int32)

    params, raw = init_params(k_param, in_features, out_features)

    h, veri_logits, c, summ_logits = tree_lstm_forward(
        params, features, node_order, adjacency_list, edge_order, root_node,
        in_features, out_features)
    jax.block_until_ready((h, veri_logits, c, summ_logits))

    assert h.shape == (num_nodes, out_features)
    assert c.shape == (num_nodes, out_features)
    assert veri_logits.shape == (1, 2)
    assert summ_logits.shape == (1, 2)

    h_ref, veri_ref, c_ref, summ_ref = reference_forward(
        raw, np.asarray(features), node_order, adjacency_list, edge_order,
        root_node, out_features)
    # all-f32 pipeline: tolerance covers MXU multi-pass f32 matmul + EUP approximations
    np.testing.assert_allclose(np.asarray(h), h_ref, rtol=2e-3, atol=2e-3)
    np.testing.assert_allclose(np.asarray(c), c_ref, rtol=2e-3, atol=2e-3)
    np.testing.assert_allclose(np.asarray(veri_logits), veri_ref, rtol=2e-3, atol=2e-3)
    np.testing.assert_allclose(np.asarray(summ_logits), summ_ref, rtol=2e-3, atol=2e-3)

    print("KERNEL_OK")
</pallas_src>

<mosaic_0001>
module attributes {stable_mosaic.version = 11 : i64} {
  func.func @_encode_kernel(%arg0: i32, %arg1: memref<24x128xf32, #tpu.memory_space<vmem>>, %arg2: memref<128x512xf32, #tpu.memory_space<vmem>>, %arg3: memref<1x512xf32, #tpu.memory_space<vmem>>, %arg4: memref<24x384xf32, #tpu.memory_space<vmem>>, %arg5: memref<24x128xf32, #tpu.memory_space<vmem>>) attributes {dimension_semantics = [#tpu.dimension_semantics<parallel>], iteration_bounds = array<i64: 1>, scalar_prefetch = 0 : i64, scratch_operands = 0 : i64, tpu.core_type = #tpu.core_type<tc>, window_params = [{transform_indices = @transform_0, window_bounds = array<i64: 24, 128>}, {pipeline_mode = #tpu.pipeline_mode<synchronous>, transform_indices = @transform_1, window_bounds = array<i64: 128, 512>}, {pipeline_mode = #tpu.pipeline_mode<synchronous>, transform_indices = @transform_2, window_bounds = array<i64: 1, 512>}, {transform_indices = @transform_3, window_bounds = array<i64: 24, 384>}, {transform_indices = @transform_4, window_bounds = array<i64: 24, 128>}]} {
    %c0 = arith.constant 0 : index
    %c0_0 = arith.constant 0 : index
    %0 = vector.load %arg1[%c0, %c0_0] : memref<24x128xf32, #tpu.memory_space<vmem>>, vector<24x128xf32>
    %c0_1 = arith.constant 0 : index
    %c0_2 = arith.constant 0 : index
    %1 = vector.load %arg2[%c0_1, %c0_2] : memref<128x512xf32, #tpu.memory_space<vmem>>, vector<128x512xf32>
    %cst = arith.constant dense<0.000000e+00> : vector<24x512xf32>
    %2 = tpu.matmul %0, %1, %cst {dimension_numbers = #tpu.dot_dimension_numbers<[1], [0], [0], [1], [0, 0, 1, 1], [], []>} : vector<24x128xf32>, vector<128x512xf32>, vector<24x512xf32> -> vector<24x512xf32>
    %c0_3 = arith.constant 0 : index
    %c0_4 = arith.constant 0 : index
    %3 = vector.load %arg3[%c0_3, %c0_4] : memref<1x512xf32, #tpu.memory_space<vmem>>, vector<1x512xf32>
    %4 = vector.broadcast %3 : vector<1x512xf32> to vector<24x512xf32>
    %5 = arith.addf %2, %4 : vector<24x512xf32>
    %6 = vector.extract_strided_slice %5 {offsets = [0, 0], sizes = [24, 384], strides = [1, 1]} : vector<24x512xf32> to vector<24x384xf32>
    %c0_5 = arith.constant 0 : index
    %c0_6 = arith.constant 0 : index
    %7 = vector.load %arg4[%c0_5, %c0_6] : memref<24x384xf32, #tpu.memory_space<vmem>>, vector<24x384xf32>
    tpu.vector_store %arg4[%c0_5, %c0_6], %6 {strides = array<i32>} : memref<24x384xf32, #tpu.memory_space<vmem>>, vector<24x384xf32>,
    %8 = vector.extract_strided_slice %5 {offsets = [0, 384], sizes = [24, 128], strides = [1, 1]} : vector<24x512xf32> to vector<24x128xf32>
    %c0_7 = arith.constant 0 : index
    %c0_8 = arith.constant 0 : index
    %9 = vector.load %arg5[%c0_7, %c0_8] : memref<24x128xf32, #tpu.memory_space<vmem>>, vector<24x128xf32>
    tpu.vector_store %arg5[%c0_7, %c0_8], %8 {strides = array<i32>} : memref<24x128xf32, #tpu.memory_space<vmem>>, vector<24x128xf32>,
    return
  }
  func.func @transform_0(%arg0: i32) -> (i32, i32) {
    %c0_i32 = arith.constant 0 : i32
    %c0_i32_0 = arith.constant 0 : i32
    return %arg0, %c0_i32 : i32, i32
  }
  func.func @transform_1(%arg0: i32) -> (i32, i32) {
    %c0_i32 = arith.constant 0 : i32
    %c0_i32_0 = arith.constant 0 : i32
    %c0_i32_1 = arith.constant 0 : i32
    return %c0_i32, %c0_i32_0 : i32, i32
  }
  func.func @transform_2(%arg0: i32) -> (i32, i32) {
    %c0_i32 = arith.constant 0 : i32
    %c0_i32_0 = arith.constant 0 : i32
    %c0_i32_1 = arith.constant 0 : i32
    return %c0_i32, %c0_i32_0 : i32, i32
  }
  func.func @transform_3(%arg0: i32) -> (i32, i32) {
    %c0_i32 = arith.constant 0 : i32
    %c0_i32_0 = arith.constant 0 : i32
    return %arg0, %c0_i32 : i32, i32
  }
  func.func @transform_4(%arg0: i32) -> (i32, i32) {
    %c0_i32 = arith.constant 0 : i32
    %c0_i32_0 = arith.constant 0 : i32
    return %arg0, %c0_i32 : i32, i32
  }
}

</mosaic_0001>

<bundles_post_ra>
// kernel: tpu_custom_call.1
= control target key start
LH: loop header
LB: loop body
LE: loop exit
PB: predicated region body
PF: predicated region fallthrough
CT: control target
= control target key end

     0   :  { %10 = vsyncpa [#allocation3], 0  ;;  %s624_s0 = inlined_call_operand.hbm [shape: f32[24,128], index: 0, kind: input, shape index: {}]   ;;  %s625_s1 = inlined_call_operand.hbm [shape: f32[128,512], index: 1, kind: input, shape index: {}]   ;;  %s626_s2 = inlined_call_operand.vmem [shape: f32[1,512], index: 2, kind: input, shape index: {}]   ;;  %s627_s3 = inlined_call_operand.hbm [shape: f32[24,384], index: 3, kind: output, shape index: {0}]   ;;  %s628_s4 = inlined_call_operand.hbm [shape: f32[24,128], index: 4, kind: output, shape index: {1}]  }
   0x1   :  { %11 = vsyncpa [#allocation6], 0 }
   0x2   :  { %12 = vsyncpa [#allocation4], 0 }
   0x3   :  { %13 = vsyncpa [#allocation9], 0  ;;  %s518_s15 = smov [#allocation2]   ;;  %s422_s19 = scalar_lea.hbm %s624_s0, 384 }
   0x4   :  { %s19_s16 = sshll.u32 %s518_s15, 4  ;;  %p423_p0 = scmp.ne.s32.totalorder %s624_s0, %s422_s19  ;;  %s20_s16 = int_to_ptr.vmem [resolvable:$true] %s19_s16 }
   0x5   :  { %p426_p1 = scmp.lt.u32.totalorder %s422_s19, %s624_s0 }
   0x7   :  { %p428_p2 = pnand %p426_p1, %p423_p0 }
   0x9   :  { %431 = shalt.err (!%p428_p2)
}
   0xa   :  { %s432_s24 = scalar_lea.vmem %s20_s16, 384  ;;  %p437_p4 = scmp.lt.s32.totalorder %s20_s16, %s20_s16 }
   0xb   :  { %p433_p3 = scmp.ne.s32.totalorder %s20_s16, %s432_s24  ;;  %p438_p5 = scmp.lt.s32.totalorder %s432_s24, %s432_s24 }
   0xd   :  { %p439_p6 = por %p438_p5, %p437_p4 }
   0xf   :  { %p440_p7 = pnand %p439_p6, %p433_p3 }
  0x11   :  { %443 = shalt.err (!%p440_p7)
}
  0x12   :  { %s519_s25 = smov 128   ;;  %s520_s26 = smov 8  }
  0x13   :  { %25 = dma.hbm_to_vmem [thread:$0]  %s624_s0, 384, %s20_s16, [#allocation3], %s519_s25, %s519_s25, %s520_s26  }
  0x14   :  { %s521_s29 = smov [#allocation5]   ;;  %s444_s7 = scalar_lea.hbm %s625_s1, 8192 }
  0x15   :  { %s31_s30 = sshll.u32 %s521_s29, 4  ;;  %p445_p8 = scmp.ne.s32.totalorder %s625_s1, %s444_s7  ;;  %s32_s30 = int_to_ptr.vmem [resolvable:$true] %s31_s30 }
  0x16   :  { %p448_p9 = scmp.lt.u32.totalorder %s444_s7, %s625_s1 }
  0x18   :  { %p450_p10 = pnand %p448_p9, %p445_p8 }
  0x1a   :  { %453 = shalt.err (!%p450_p10)
}
  0x1b   :  { %s454_s12 = scalar_lea.vmem %s32_s30, 8192  ;;  %p459_p12 = scmp.lt.s32.totalorder %s32_s30, %s32_s30 }
  0x1c   :  { %p455_p11 = scmp.ne.s32.totalorder %s32_s30, %s454_s12  ;;  %p460_p13 = scmp.lt.s32.totalorder %s454_s12, %s454_s12 }
  0x1e   :  { %p461_p0 = por %p460_p13, %p459_p12 }
  0x20   :  { %p462_p1 = pnand %p461_p0, %p455_p11 }
  0x22   :  { %465 = shalt.err (!%p462_p1)
}
  0x23   :  { %s522_s0 = smov 512   ;;  %s523_s13 = smov 32  }
  0x24   :  { %37 = dma.hbm_to_vmem [thread:$0]  %s625_s1, 8192, %s32_s30, [#allocation6], %s522_s0, %s522_s0, %s523_s13  }
  0x25   :  { %510 = dma.done.wait [#allocation3], 384  }
  0x26   :  { %511 = vsyncadd [#allocation3], 4294966912 }
  0x27   :  { %512 = dma.done.wait [#allocation6], 8192  }
  0x28   :  { %513 = vsyncadd [#allocation6], 4294959104  ;;  %v524_v0 = vmov 0.0   ;;  %v50_v1 = vld [vmem:[#allocation5 + $0x8] sm:$0xff]  ;;  %v52_v3 = vld [vmem:[#allocation5 + $0x18] sm:$0xff]  ;;  %s526_s18 = smov [#allocation8]  }
  0x29   :  { %199 = vmatprep.mubr.f32.mxu0 %v524_v0  ;;  %282 = vmatprep.mubr.f32.mxu1 %v524_v0  ;;  %v54_v2 = vld [vmem:[#allocation5 + $0x28] sm:$0xff]  ;;  %v56_v5 = vld [vmem:[#allocation5 + $0x38] sm:$0xff]  ;;  %v49_v6 = vld [vmem:[#allocation5] sm:$0xff]  ;;  %s330_s19 = sshll.u32 %s526_s18, 4  ;;  %s590_s19 = int_to_ptr.vmem [resolvable:$true] %s330_s19 }
  0x2a   :  { %v347_v4 = vpack.c.bf16 %v54_v2, %v50_v1  ;;  %v53_v7 = vld [vmem:[#allocation5 + $0x20] sm:$0xff]  ;;  %v379_v8 = vpack.c.bf16 %v56_v5, %v52_v3  ;;  %v51_v10 = vld [vmem:[#allocation5 + $0x10] sm:$0xff]  ;;  %v58_v12 = vld [vmem:[#allocation5 + $0x48] sm:$0xff] }
  0x2b   :  { %v349_v9 = vpack.c.bf16 %v53_v7, %v49_v6  ;;  %v55_v11 = vld [vmem:[#allocation5 + $0x30] sm:$0xff]  ;;  %v62_v14 = vld [vmem:[#allocation5 + $0x68] sm:$0xff]  ;;  %v60_v15 = vld [vmem:[#allocation5 + $0x58] sm:$0xff] }
  0x2c   :  { %348 = vmatprep.subr.bf16.mxu0 %v347_v4  ;;  %v381_v13 = vpack.c.bf16 %v55_v11, %v51_v10  ;;  %v64_v16 = vld [vmem:[#allocation5 + $0x78] sm:$0xff]  ;;  %380 = vmatprep.subr.bf16.mxu1 %v379_v8  ;;  %v351_v17 = vpack.c.bf16 %v62_v14, %v58_v12  ;;  %v57_v19 = vld [vmem:[#allocation5 + $0x40] sm:$0xff]  ;;  %v59_v21 = vld [vmem:[#allocation5 + $0x50] sm:$0xff] }
  0x2d   :  { %350 = vmatpush1.bf16.msra.mxu0 %v349_v9  ;;  %v383_v18 = vpack.c.bf16 %v64_v16, %v60_v15  ;;  %v61_v20 = vld [vmem:[#allocation5 + $0x60] sm:$0xff]  ;;  %v63_v23 = vld [vmem:[#allocation5 + $0x70] sm:$0xff]  ;;  %v66_v24 = vld [vmem:[#allocation5 + $0x88] sm:$0xff] }
  0x2e   :  { %382 = vmatpush1.bf16.msra.mxu1 %v381_v13  ;;  %v353_v22 = vpack.c.bf16 %v61_v20, %v57_v19  ;;  %v70_v25 = vld [vmem:[#allocation5 + $0xa8] sm:$0xff]  ;;  %352 = vmatprep.subr.bf16.mxu0 %v351_v17  ;;  %v385_v26 = vpack.c.bf16 %v63_v23, %v59_v21  ;;  %v68_v28 = vld [vmem:[#allocation5 + $0x98] sm:$0xff]  ;;  %v65_v30 = vld [vmem:[#allocation5 + $0x80] sm:$0xff] }
  0x2f   :  { %384 = vmatprep.subr.bf16.mxu1 %v383_v18  ;;  %v355_v27 = vpack.c.bf16 %v70_v25, %v66_v24  ;;  %v72_v29 = vld [vmem:[#allocation5 + $0xb8] sm:$0xff]  ;;  %v69_v32 = vld [vmem:[#allocation5 + $0xa0] sm:$0xff]  ;;  %v67_v33 = vld [vmem:[#allocation5 + $0x90] sm:$0xff] }
  0x30   :  { %v387_v31 = vpack.c.bf16 %v72_v29, %v68_v28  ;;  %v71_v34 = vld [vmem:[#allocation5 + $0xb0] sm:$0xff]  ;;  %v357_v35 = vpack.c.bf16 %v69_v32, %v65_v30  ;;  %v74_v36 = vld [vmem:[#allocation5 + $0xc8] sm:$0xff]  ;;  %v76_v38 = vld [vmem:[#allocation5 + $0xd8] sm:$0xff] }
  0x31   :  { %354 = vmatpush1.bf16.msra.mxu0 %v353_v22  ;;  %v78_v37 = vld [vmem:[#allocation5 + $0xe8] sm:$0xff]  ;;  %v389_v39 = vpack.c.bf16 %v71_v34, %v67_v33  ;;  %v80_v41 = vld [vmem:[#allocation5 + $0xf8] sm:$0xff]  ;;  %v73_v42 = vld [vmem:[#allocation5 + $0xc0] sm:$0xff] }
  0x32   :  { %386 = vmatpush1.bf16.msra.mxu1 %v385_v26  ;;  %356 = vmatprep.subr.bf16.mxu0 %v355_v27  ;;  %v359_v40 = vpack.c.bf16 %v78_v37, %v74_v36  ;;  %v77_v43 = vld [vmem:[#allocation5 + $0xe0] sm:$0xff]  ;;  %v391_v44 = vpack.c.bf16 %v80_v41, %v76_v38  ;;  %v75_v45 = vld [vmem:[#allocation5 + $0xd0] sm:$0xff]  ;;  %v82_v47 = vld [vmem:[#allocation5 + $0x108] sm:$0xff]  ;;  %v115_v37 = vlaneseq }
  0x33   :  { %388 = vmatprep.subr.bf16.mxu1 %v387_v31  ;;  %v79_v46 = vld [vmem:[#allocation5 + $0xf0] sm:$0xff]  ;;  %v86_v48 = vld [vmem:[#allocation5 + $0x128] sm:$0xff]  ;;  %v84_v49 = vld [vmem:[#allocation5 + $0x118] sm:$0xff]  ;;  %v361_v51 = vpack.c.bf16 %v77_v43, %v73_v42 }
  0x34   :  { %v88_v50 = vld [vmem:[#allocation5 + $0x138] sm:$0xff]  ;;  %v393_v52 = vpack.c.bf16 %v79_v46, %v75_v45  ;;  %v363_v53 = vpack.c.bf16 %v86_v48, %v82_v47  ;;  %v81_v54 = vld [vmem:[#allocation5 + $0x100] sm:$0xff]  ;;  %v83_v56 = vld [vmem:[#allocation5 + $0x110] sm:$0xff]  ;;  %v116_v38 = vshrl.u32 %v115_v37, 7 }
  0x35   :  { %358 = vmatpush1.bf16.msra.mxu0 %v357_v35  ;;  %v85_v55 = vld [vmem:[#allocation5 + $0x120] sm:$0xff]  ;;  %v395_v57 = vpack.c.bf16 %v88_v50, %v84_v49  ;;  %v87_v58 = vld [vmem:[#allocation5 + $0x130] sm:$0xff]  ;;  %v90_v59 = vld [vmem:[#allocation5 + $0x148] sm:$0xff] }
  0x36   :  { %390 = vmatpush1.bf16.msra.mxu1 %v389_v39  ;;  %360 = vmatprep.subr.bf16.mxu0 %v359_v40  ;;  %v94_v60 = vld [vmem:[#allocation5 + $0x168] sm:$0xff]  ;;  %v92_v61 = vld [vmem:[#allocation5 + $0x158] sm:$0xff]  ;;  %v365_v63 = vpack.c.bf16 %v85_v55, %v81_v54  ;;  %v397_v1 = vpack.c.bf16 %v87_v58, %v83_v56  ;;  %v89_v3 = vld [vmem:[#allocation5 + $0x140] sm:$0xff]  ;;  %v117_v39 = vsub.s32 0, %v116_v38  ;;  %v125_v41 = vsub.s32 2, %v116_v38 }
  0x37   :  { %392 = vmatprep.subr.bf16.mxu1 %v391_v44  ;;  %v96_v62 = vld [vmem:[#allocation5 + $0x178] sm:$0xff]  ;;  %v367_v2 = vpack.c.bf16 %v94_v60, %v90_v59  ;;  %v93_v4 = vld [vmem:[#allocation5 + $0x160] sm:$0xff]  ;;  %v91_v5 = vld [vmem:[#allocation5 + $0x150] sm:$0xff]  ;;  %v121_v42 = vsub.s32 1, %v116_v38  ;;  %v129_v43 = vsub.s32 3, %v116_v38 }
  0x38   :  { %v399_v6 = vpack.c.bf16 %v96_v62, %v92_v61  ;;  %v95_v7 = vld [vmem:[#allocation5 + $0x170] sm:$0xff]  ;;  %v98_v8 = vld [vmem:[#allocation5 + $0x188] sm:$0xff]  ;;  %v100_v10 = vld [vmem:[#allocation5 + $0x198] sm:$0xff]  ;;  %v369_v12 = vpack.c.bf16 %v93_v4, %v89_v3 }
  0x39   :  { %362 = vmatpush1.bf16.msra.mxu0 %v361_v51  ;;  %v102_v9 = vld [vmem:[#allocation5 + $0x1a8] sm:$0xff]  ;;  %v104_v11 = vld [vmem:[#allocation5 + $0x1b8] sm:$0xff]  ;;  %v401_v13 = vpack.c.bf16 %v95_v7, %v91_v5  ;;  %v97_v15 = vld [vmem:[#allocation5 + $0x180] sm:$0xff] }
  0x3a   :  { %394 = vmatpush1.bf16.msra.mxu1 %v393_v52  ;;  %364 = vmatprep.subr.bf16.mxu0 %v363_v53  ;;  %v371_v14 = vpack.c.bf16 %v102_v9, %v98_v8  ;;  %v101_v16 = vld [vmem:[#allocation5 + $0x1a0] sm:$0xff]  ;;  %v99_v17 = vld [vmem:[#allocation5 + $0x190] sm:$0xff]  ;;  %v403_v18 = vpack.c.bf16 %v104_v11, %v100_v10  ;;  %v106_v20 = vld [vmem:[#allocation5 + $0x1c8] sm:$0xff] }
  0x3b   :  { %396 = vmatprep.subr.bf16.mxu1 %v395_v57  ;;  %v103_v19 = vld [vmem:[#allocation5 + $0x1b0] sm:$0xff]  ;;  %v110_v21 = vld [vmem:[#allocation5 + $0x1e8] sm:$0xff]  ;;  %v108_v22 = vld [vmem:[#allocation5 + $0x1d8] sm:$0xff]  ;;  %v373_v24 = vpack.c.bf16 %v101_v16, %v97_v15 }
  0x3c   :  { %v112_v23 = vld [vmem:[#allocation5 + $0x1f8] sm:$0xff]  ;;  %v405_v25 = vpack.c.bf16 %v103_v19, %v99_v17  ;;  %v375_v26 = vpack.c.bf16 %v110_v21, %v106_v20  ;;  %v105_v27 = vld [vmem:[#allocation5 + $0x1c0] sm:$0xff]  ;;  %v107_v30 = vld [vmem:[#allocation5 + $0x1d0] sm:$0xff] }
  0x3d   :  { %366 = vmatpush1.bf16.msra.mxu0 %v365_v63  ;;  %v109_v28 = vld [vmem:[#allocation5 + $0x1e0] sm:$0xff]  ;;  %v407_v29 = vpack.c.bf16 %v112_v23, %v108_v22  ;;  %v111_v31 = vld [vmem:[#allocation5 + $0x1f0] sm:$0xff]  ;;  %v46_v34 = vld [vmem:[#allocation2] sm:$0xff] }
  0x3e   :  { %398 = vmatpush1.bf16.msra.mxu1 %v397_v1  ;;  %368 = vmatprep.subr.bf16.mxu0 %v367_v2  ;;  %v377_v32 = vpack.c.bf16 %v109_v28, %v105_v27  ;;  %v409_v33 = vpack.c.bf16 %v111_v31, %v107_v30  ;;  %v47_v35 = vld [vmem:[#allocation2 + $0x8] sm:$0xff]  ;;  %v48_v36 = vld [vmem:[#allocation2 + $0x10] sm:$0xff]  ;;  %v113_v40 = vld [vmem:[%s626_s2] sm:$0xf]  ;;  %s525_s2 = smov [#allocation7]  }
  0x3f   :  { %400 = vmatprep.subr.bf16.mxu1 %v399_v6  ;;  %v118_v44 = vrot.slane %v113_v40, %v117_v39  ;;  %v126_v45 = vrot.slane %v113_v40, %v125_v41  ;;  %v122_v46 = vrot.slane %v113_v40, %v121_v42  ;;  %v130_v47 = vrot.slane %v113_v40, %v129_v43  ;;  %s318_s17 = sshll.u32 %s525_s2, 4  ;;  %s319_s17 = int_to_ptr.vmem [resolvable:$true] %s318_s17 }
  0x40   :  { %s466_s20 = scalar_lea.vmem %s319_s17, 1152  ;;  %p471_p3 = scmp.lt.s32.totalorder %s319_s17, %s319_s17 }
  0x41   :  { %370 = vmatpush1.bf16.msra.mxu0 %v369_v12  ;;  %p467_p2 = scmp.ne.s32.totalorder %s319_s17, %s466_s20  ;;  %p472_p4 = scmp.lt.s32.totalorder %s466_s20, %s466_s20 }
  0x42   :  { %402 = vmatpush1.bf16.msra.mxu1 %v401_v13  ;;  %372 = vmatprep.subr.bf16.mxu0 %v371_v14 }
  0x43   :  { %404 = vmatprep.subr.bf16.mxu1 %v403_v18  ;;  %p473_p5 = por %p472_p4, %p471_p3 }
  0x45   :  { %374 = vmatpush1.bf16.msra.mxu0 %v373_v24  ;;  %p474_p6 = pnand %p473_p5, %p467_p2 }
  0x46   :  { %406 = vmatpush1.bf16.msra.mxu1 %v405_v25  ;;  %376 = vmatprep.subr.bf16.mxu0 %v375_v26 }
  0x47   :  { %408 = vmatprep.subr.bf16.mxu1 %v407_v29 }
  0x49   :  { %378 = vmatpush1.bf16.msra.mxu0 %v377_v32 }
  0x4a   :  { %410 = vmatpush1.bf16.msra.mxu1 %v409_v33 }
  0x4c   :  { %200 = vmatmul.mubr.f32.vlgmr.msra.gmra.mrb[0].mxu0 %v46_v34 }
  0x4d   :  { %283 = vmatmul.mubr.f32.vlgmr.msra.gmra.mrb[0].mxu1 %v46_v34  ;;  %205 = vmatprep.mubr.f32.mxu0 %v524_v0 }
  0x4e   :  { %288 = vmatprep.mubr.f32.mxu1 %v524_v0 }
  0x50   :  { %206 = vmatmul.mubr.f32.gmra.mrb[2].mxu0 %v47_v35 }
  0x51   :  { %289 = vmatmul.mubr.f32.gmra.mrb[2].mxu1 %v47_v35  ;;  %211 = vmatprep.mubr.f32.mxu0 %v524_v0 }
  0x52   :  { %294 = vmatprep.mubr.f32.mxu1 %v524_v0 }
  0x54   :  { %212 = vmatmul.mubr.f32.gmra.mrb[4].mxu0 %v48_v36 }
  0x55   :  { %295 = vmatmul.mubr.f32.gmra.mrb[4].mxu1 %v48_v36 }
 0x11f   :  { %v201_v48 = vpop.f32.mrb[0].mxu0 }
 0x120   :  { %v202_v49 = vadd.f32 %v201_v48, %v118_v44  ;;  %v284_v50 = vpop.f32.mrb[0].mxu1  ;;  %v203_v0 = vpop.f32.mrb[1].mxu0 }
 0x121   :  { %v285_v51 = vadd.f32 %v284_v50, %v126_v45  ;;  %v204_v52 = vadd.f32 %v203_v0, %v122_v46  ;;  %v286_v53 = vpop.f32.mrb[1].mxu1 }
 0x122   :  { %301 = vst [vmem:[#allocation7] sm:$0xff] %v202_v49  ;;  %v287_v54 = vadd.f32 %v286_v53, %v130_v47 }
 0x123   :  { %303 = vst [vmem:[#allocation7 + $0x10] sm:$0xff] %v285_v51  ;;  %302 = vst [vmem:[#allocation7 + $0x8] sm:$0xff] %v204_v52  ;;  %v207_v55 = vpop.f32.mrb[2].mxu0 }
 0x124   :  { %310 = vst [vmem:[#allocation8] sm:$0xff] %v287_v54  ;;  %v208_v56 = vadd.f32 %v207_v55, %v118_v44  ;;  %v290_v57 = vpop.f32.mrb[2].mxu1  ;;  %v209_v58 = vpop.f32.mrb[3].mxu0 }
 0x125   :  { %v291_v59 = vadd.f32 %v290_v57, %v126_v45  ;;  %v210_v60 = vadd.f32 %v209_v58, %v122_v46  ;;  %v292_v61 = vpop.f32.mrb[3].mxu1 }
 0x126   :  { %304 = vst [vmem:[#allocation7 + $0x18] sm:$0xff] %v208_v56  ;;  %v293_v62 = vadd.f32 %v292_v61, %v130_v47 }
 0x127   :  { %306 = vst [vmem:[#allocation7 + $0x28] sm:$0xff] %v291_v59  ;;  %305 = vst [vmem:[#allocation7 + $0x20] sm:$0xff] %v210_v60  ;;  %v213_v63 = vpop.f32.mrb[4].mxu0 }
 0x128   :  { %311 = vst [vmem:[#allocation8 + $0x8] sm:$0xff] %v293_v62  ;;  %v214_v1 = vadd.f32 %v213_v63, %v118_v44  ;;  %v296_v2 = vpop.f32.mrb[4].mxu1  ;;  %v215_v3 = vpop.f32.mrb[5].mxu0 }
 0x129   :  { %v297_v4 = vadd.f32 %v296_v2, %v126_v45  ;;  %v216_v5 = vadd.f32 %v215_v3, %v122_v46  ;;  %v298_v6 = vpop.f32.mrb[5].mxu1 }
 0x12a   :  { %307 = vst [vmem:[#allocation7 + $0x30] sm:$0xff] %v214_v1  ;;  %v299_v7 = vadd.f32 %v298_v6, %v130_v47 }
 0x12b   :  { %309 = vst [vmem:[#allocation7 + $0x40] sm:$0xff] %v297_v4  ;;  %308 = vst [vmem:[#allocation7 + $0x38] sm:$0xff] %v216_v5 }
 0x12c   :  { %312 = vst [vmem:[#allocation8 + $0x10] sm:$0xff] %v299_v7 }
 0x12d   :  { %477 = shalt.err (!%p474_p6)
}
 0x12e   :  { %s478_s23 = scalar_lea.hbm %s627_s3, 1152 }
 0x12f   :  { %p479_p7 = scmp.ne.s32.totalorder %s627_s3, %s478_s23  ;;  %p482_p8 = scmp.lt.u32.totalorder %s478_s23, %s627_s3 }
 0x131   :  { %p484_p9 = pnand %p482_p8, %p479_p7 }
 0x133   :  { %487 = shalt.err (!%p484_p9)
}
 0x134   :  { %s527_s30 = smov 384   ;;  %s528_s5 = smov 24  }
 0x135   :  { %324 = dma.vmem_to_hbm [thread:$0]  %s319_s17, 1152, %s627_s3, [#allocation4], %s527_s30, %s527_s30, %s528_s5  }
 0x136   :  { %s488_s8 = scalar_lea.vmem %s590_s19, 384  ;;  %p493_p11 = scmp.lt.s32.totalorder %s590_s19, %s590_s19 }
 0x137   :  { %p489_p10 = scmp.ne.s32.totalorder %s590_s19, %s488_s8  ;;  %p494_p12 = scmp.lt.s32.totalorder %s488_s8, %s488_s8 }
 0x139   :  { %p495_p13 = por %p494_p12, %p493_p11 }
 0x13b   :  { %p496_p0 = pnand %p495_p13, %p489_p10 }
 0x13d   :  { %499 = shalt.err (!%p496_p0)
}
 0x13e   :  { %s500_s11 = scalar_lea.hbm %s628_s4, 384 }
 0x13f   :  { %p501_p1 = scmp.ne.s32.totalorder %s628_s4, %s500_s11  ;;  %p504_p2 = scmp.lt.u32.totalorder %s500_s11, %s628_s4 }
 0x141   :  { %p506_p3 = pnand %p504_p2, %p501_p1 }
 0x143   :  { %509 = shalt.err (!%p506_p3)
}
 0x144   :  { %336 = dma.vmem_to_hbm [thread:$0]  %s590_s19, 384, %s628_s4, [#allocation9], %s519_s25, %s519_s25, %s520_s26  }
 0x145   :  { %514 = dma.done.wait [#allocation4], 1152  }
 0x146   :  { %515 = vsyncadd [#allocation4], 4294966144 }
 0x147   :  { %516 = dma.done.wait [#allocation9], 384  }
 0x148   :  { %517 = vsyncadd [#allocation9], 4294966912 }
 0x149   :  { %343 = vsyncpa [#allocation3], 1 }
 0x14a   :  { %344 = vsyncpa [#allocation6], 1 }
 0x14b   :  { %345 = vsyncpa [#allocation4], 1 }
 0x14c   :  { %346 = vsyncpa [#allocation9], 1 }

</bundles_post_ra>
